<compile_context>
chip_gen: v5e
topology: v5e:2x2
jax: 0.10.0
libtpu: 0.0.40
codegen_flags: <defaults>
</compile_context>

<pallas_src>
import functools

import jax
import jax.numpy as jnp
from jax.experimental import pallas as pl
from jax.experimental.pallas import tpu as pltpu


def _round_up(x, m):
    return ((x + m - 1) // m) * m


def _hw_tile_config():
    """Generation-aware tile-size / VMEM-limit defaults.

    v5e / v6e: 128 MiB physical VMEM -> wide tiles + raised scoped limit.
    v7x: 64 MiB per TensorCore -> keep the double-buffered footprint well
    under that and leave room for >= 2 output tiles so both TCs get work.
    """
    vmem_bytes = 64 << 20
    try:
        info = pltpu.get_tpu_info()
        vmem_bytes = int(getattr(info, "vmem_capacity_bytes", vmem_bytes))
    except Exception:
        pass
    if vmem_bytes >= (100 << 20):  # v5e / v6e class (128 MiB physical)
        return dict(tm=512, tn=1024, tk=2048, vmem_limit=96 << 20)
    return dict(tm=512, tn=512, tk=2048, vmem_limit=48 << 20)  # v7x / unknown


def mlp_kernel(x_ref, w_ref, b_ref, o_ref):
    # x_ref: (tm, tk) bf16, w_ref: (tk, tn) bf16 (pre-transposed),
    # b_ref: (1, tn) f32, o_ref: (tm, tn) f32.  The output block's index_map
    # ignores k, so it is VMEM-resident across the reduction and serves as the
    # f32 accumulator directly.
    k = pl.program_id(2)

    @pl.when(k == 0)
    def _init():
        o_ref[...] = jnp.zeros_like(o_ref)

    o_ref[...] += jnp.dot(
        x_ref[...], w_ref[...], preferred_element_type=jnp.float32
    )

    @pl.when(k == pl.num_programs(2) - 1)
    def _epilogue():
        # Bias + ReLU in f32.  Dropout (eval mode / rate 0.0) is identity.
        o_ref[...] = jnp.maximum(o_ref[...] + b_ref[...], 0.0)


@functools.partial(
    jax.jit, static_argnames=("tm_cap", "tn", "tk", "n_out", "vmem_limit")
)
def _mlp_forward(x, w_p, b_p, *, tm_cap, tn, tk, n_out, vmem_limit):
    """x: (B, n_in); w_p: (K, N) bf16 pre-transposed+padded; b_p: (1, N) f32."""
    B, n_in = x.shape
    K, N = w_p.shape

    # Row tile: at least 16 (bf16 sublane packing), at most tm_cap.
    tm = min(tm_cap, _round_up(B, 16))
    M = _round_up(B, tm)

    x_c = x.astype(w_p.dtype)
    if M != B or K != n_in:
        # TODO(synk): ragged-edge handling via masked edge tiles instead of a
        # padded copy would save one HBM round trip of x for odd shapes.
        x_c = jnp.pad(x_c, ((0, M - B), (0, K - n_in)))

    grid = (M // tm, N // tn, K // tk)

    # Advisory cost: x is re-read once per N tile, the weight once per M tile.
    cost = pl.CostEstimate(
        flops=2 * M * K * N,
        transcendentals=0,
        bytes_accessed=(
            grid[1] * M * K * x_c.dtype.itemsize    # x stream
            + grid[0] * K * N * w_p.dtype.itemsize  # weight stream
            + grid[0] * N * b_p.dtype.itemsize      # bias stream
            + M * N * 4                             # f32 output
        ),
    )

    out = pl.pallas_call(
        mlp_kernel,
        out_shape=jax.ShapeDtypeStruct((M, N), jnp.float32),
        grid_spec=pltpu.PrefetchScalarGridSpec(
            num_scalar_prefetch=0,
            grid=grid,
            in_specs=[
                pl.BlockSpec((tm, tk), lambda i, j, k: (i, k)),  # x tile
                pl.BlockSpec((tk, tn), lambda i, j, k: (k, j)),  # w^T tile
                pl.BlockSpec((1, tn), lambda i, j, k: (0, j)),   # bias tile
            ],
            out_specs=pl.BlockSpec((tm, tn), lambda i, j, k: (i, j)),
        ),
        compiler_params=pltpu.CompilerParams(
            dimension_semantics=("parallel", "parallel", "arbitrary"),
            vmem_limit_bytes=vmem_limit,
        ),
        cost_estimate=cost,
    )(x_c, w_p, b_p)

    if M != B or N != n_out:
        out = out[:B, :n_out]
    return out


def make_mlp_forward(w, b, *, compute_dtype=jnp.bfloat16):
    """Prepare (transpose / pad / cast) the parameters ONCE and return a jit'd
    forward closure computing relu(x @ w.T + b) in f32 (eval-mode dropout)."""
    n_out, n_in = w.shape
    cfg = _hw_tile_config()

    tn = min(cfg["tn"], _round_up(n_out, 128))
    tk = min(cfg["tk"], _round_up(n_in, 128))
    K = _round_up(n_in, tk)
    N = _round_up(n_out, tn)

    # One-time weight prep, hoisted out of the per-call path: contraction dim
    # on sublanes, lane-dense N, bf16 operands for the MXU, f32 bias.
    w_t = jnp.transpose(w).astype(compute_dtype)  # (n_in, n_out)
    if K != n_in or N != n_out:
        w_t = jnp.pad(w_t, ((0, K - n_in), (0, N - n_out)))
    b_p = b.astype(jnp.float32)
    if N != n_out:
        b_p = jnp.pad(b_p, (0, N - n_out))
    b_p = b_p.reshape(1, N)
    w_t, b_p = jax.device_put((w_t, b_p))

    def forward(x):
        return _mlp_forward(
            x, w_t, b_p,
            tm_cap=cfg["tm"], tn=tn, tk=tk, n_out=n_out,
            vmem_limit=cfg["vmem_limit"],
        )

    return forward


if __name__ == "__main__":
    # Small shapes consistent with MLP(n_in=32, n_out=64), batch of 8 rows.
    B, n_in, n_out = 8, 32, 64

    key = jax.random.PRNGKey(0)
    kx, kw, kb = jax.random.split(key, 3)

    x = jax.random.normal(kx, (B, n_in), dtype=jnp.float32)
    bound = 1.0 / (n_in ** 0.5)
    w = jax.random.uniform(kw, (n_out, n_in), minval=-bound, maxval=bound,
                           dtype=jnp.float32)
    b = jax.random.uniform(kb, (n_out,), minval=-bound, maxval=bound,
                           dtype=jnp.float32)

    forward = make_mlp_forward(w, b)
    out = jax.block_until_ready(forward(x))

    # References: bf16-operand / f32-accumulate (matches kernel numerics) and
    # the full-f32 module semantics (loose tolerance for the bf16 cast).
    ref_bf16 = jnp.maximum(
        jnp.dot(x.astype(jnp.bfloat16), w.T.astype(jnp.bfloat16),
                preferred_element_type=jnp.float32) + b, 0.0)
    ref_f32 = jnp.maximum(x @ w.T + b, 0.0)

    assert out.shape == (B, n_out)
    assert out.dtype == jnp.float32
    assert jnp.allclose(out, ref_bf16, atol=1e-4, rtol=1e-4)
    assert jnp.allclose(out, ref_f32, atol=5e-2, rtol=5e-2)

    print("KERNEL_OK")
</pallas_src>

<mosaic_0001>
module attributes {stable_mosaic.version = 11 : i64} {
  func.func @mlp_kernel(%arg0: i32, %arg1: i32, %arg2: i32, %arg3: memref<16x128xbf16, #tpu.memory_space<vmem>>, %arg4: memref<128x128xbf16, #tpu.memory_space<vmem>>, %arg5: memref<1x128xf32, #tpu.memory_space<vmem>>, %arg6: memref<16x128xf32, #tpu.memory_space<vmem>>) attributes {dimension_semantics = [#tpu.dimension_semantics<parallel>, #tpu.dimension_semantics<parallel>, #tpu.dimension_semantics<arbitrary>], iteration_bounds = array<i64: 1, 1, 1>, scalar_prefetch = 0 : i64, scratch_operands = 0 : i64, tpu.core_type = #tpu.core_type<tc>, window_params = [{transform_indices = @transform_0, window_bounds = array<i64: 16, 128>}, {transform_indices = @transform_1, window_bounds = array<i64: 128, 128>}, {transform_indices = @transform_2, window_bounds = array<i64: 1, 128>}, {transform_indices = @transform_3, window_bounds = array<i64: 16, 128>}]} {
    %c0_i32 = arith.constant 0 : i32
    %0 = arith.cmpi eq, %arg2, %c0_i32 : i32
    %1 = arith.extui %0 : i1 to i32
    %c0_i32_0 = arith.constant 0 : i32
    %2 = arith.cmpi ne, %1, %c0_i32_0 : i32
    scf.if %2 {
      %cst_10 = arith.constant 0.000000e+00 : f32
      %12 = vector.broadcast %cst_10 : f32 to vector<16x128xf32>
      %c0_11 = arith.constant 0 : index
      %c0_12 = arith.constant 0 : index
      %13 = vector.load %arg6[%c0_11, %c0_12] : memref<16x128xf32, #tpu.memory_space<vmem>>, vector<16x128xf32>
      tpu.vector_store %arg6[%c0_11, %c0_12], %12 {strides = array<i32>} : memref<16x128xf32, #tpu.memory_space<vmem>>, vector<16x128xf32>,
    } else {
    }
    %c0 = arith.constant 0 : index
    %c0_1 = arith.constant 0 : index
    %3 = vector.load %arg6[%c0, %c0_1] : memref<16x128xf32, #tpu.memory_space<vmem>>, vector<16x128xf32>
    %c0_2 = arith.constant 0 : index
    %c0_3 = arith.constant 0 : index
    %4 = vector.load %arg3[%c0_2, %c0_3] : memref<16x128xbf16, #tpu.memory_space<vmem>>, vector<16x128xbf16>
    %c0_4 = arith.constant 0 : index
    %c0_5 = arith.constant 0 : index
    %5 = vector.load %arg4[%c0_4, %c0_5] : memref<128x128xbf16, #tpu.memory_space<vmem>>, vector<128x128xbf16>
    %cst = arith.constant dense<0.000000e+00> : vector<16x128xf32>
    %6 = tpu.matmul %4, %5, %cst {dimension_numbers = #tpu.dot_dimension_numbers<[1], [0], [0], [1], [0, 0, 1, 1], [], []>} : vector<16x128xbf16>, vector<128x128xbf16>, vector<16x128xf32> -> vector<16x128xf32>
    %7 = arith.addf %3, %6 : vector<16x128xf32>
    %c0_6 = arith.constant 0 : index
    %c0_7 = arith.constant 0 : index
    %8 = vector.load %arg6[%c0_6, %c0_7] : memref<16x128xf32, #tpu.memory_space<vmem>>, vector<16x128xf32>
    tpu.vector_store %arg6[%c0_6, %c0_7], %7 {strides = array<i32>} : memref<16x128xf32, #tpu.memory_space<vmem>>, vector<16x128xf32>,
    %c0_i32_8 = arith.constant 0 : i32
    %9 = arith.cmpi eq, %arg2, %c0_i32_8 : i32
    %10 = arith.extui %9 : i1 to i32
    %c0_i32_9 = arith.constant 0 : i32
    %11 = arith.cmpi ne, %10, %c0_i32_9 : i32
    scf.if %11 {
      %c0_10 = arith.constant 0 : index
      %c0_11 = arith.constant 0 : index
      %12 = vector.load %arg6[%c0_10, %c0_11] : memref<16x128xf32, #tpu.memory_space<vmem>>, vector<16x128xf32>
      %c0_12 = arith.constant 0 : index
      %c0_13 = arith.constant 0 : index
      %13 = vector.load %arg5[%c0_12, %c0_13] : memref<1x128xf32, #tpu.memory_space<vmem>>, vector<1x128xf32>
      %14 = vector.broadcast %13 : vector<1x128xf32> to vector<16x128xf32>
      %15 = arith.addf %12, %14 : vector<16x128xf32>
      %cst_14 = arith.constant 0.000000e+00 : f32
      %16 = vector.broadcast %cst_14 : f32 to vector<16x128xf32>
      %17 = arith.maximumf %15, %16 : vector<16x128xf32>
      %c0_15 = arith.constant 0 : index
      %c0_16 = arith.constant 0 : index
      %18 = vector.load %arg6[%c0_15, %c0_16] : memref<16x128xf32, #tpu.memory_space<vmem>>, vector<16x128xf32>
      tpu.vector_store %arg6[%c0_15, %c0_16], %17 {strides = array<i32>} : memref<16x128xf32, #tpu.memory_space<vmem>>, vector<16x128xf32>,
    } else {
    }
    return
  }
  func.func @transform_0(%arg0: i32, %arg1: i32, %arg2: i32) -> (i32, i32) {
    %c0_i32 = arith.constant 0 : i32
    return %arg0, %arg2 : i32, i32
  }
  func.func @transform_1(%arg0: i32, %arg1: i32, %arg2: i32) -> (i32, i32) {
    %c0_i32 = arith.constant 0 : i32
    return %arg2, %arg1 : i32, i32
  }
  func.func @transform_2(%arg0: i32, %arg1: i32, %arg2: i32) -> (i32, i32) {
    %c0_i32 = arith.constant 0 : i32
    %c0_i32_0 = arith.constant 0 : i32
    return %c0_i32, %arg1 : i32, i32
  }
  func.func @transform_3(%arg0: i32, %arg1: i32, %arg2: i32) -> (i32, i32) {
    %c0_i32 = arith.constant 0 : i32
    return %arg0, %arg1 : i32, i32
  }
}

</mosaic_0001>

<bundles_post_ra>
// kernel: _mlp_forward.1
= control target key start
LH: loop header
LB: loop body
LE: loop exit
PB: predicated region body
PF: predicated region fallthrough
CT: control target
= control target key end

     0   :  { %8 = vsyncpa [#allocation3], 0  ;;  %s224_s15 = smov [#allocation2]   ;;  %s225_s17 = smov 64   ;;  %s262_s0 = inlined_call_operand.vmem [shape: bf16[16,128], index: 0, kind: input, shape index: {}]   ;;  %s263_s1 = inlined_call_operand.hbm [shape: bf16[128,128], index: 1, kind: input, shape index: {}]   ;;  %s264_s2 = inlined_call_operand.vmem [shape: f32[1,128], index: 2, kind: input, shape index: {}]   ;;  %s265_s3 = inlined_call_operand.vmem [shape: f32[16,128], index: 3, kind: output, shape index: {}]  }
   0x1   :  { %s15_s14 = sshll.u32 %s263_s1, 4  ;;  %s17_s16 = sshll.u32 %s224_s15, 4  ;;  %s16_s14 = int_to_ptr.hbm [resolvable:$true] %s15_s14  ;;  %s18_s16 = int_to_ptr.vmem [resolvable:$true] %s17_s16 }
   0x2   :  { %s226_s18 = smov 4  }
   0x3   :  { %23 = dma.hbm_to_vmem [thread:$0]  %s16_s14, 1024, %s18_s16, [#allocation3], %s225_s17, %s225_s17, %s226_s18  }
   0x4   :  { %222 = dma.done.wait [#allocation3], 1024  }
   0x5   :  { %223 = vsyncadd [#allocation3], 4294966272  ;;  %v192_v0 = vld [vmem:[#allocation2 + $0x38] sm:$0xff]  ;;  %v191_v1 = vld [vmem:[#allocation2 + $0x30] sm:$0xff] }
   0x6   :  { %110 = vmatpush.bf16.msra.mxu0 %v192_v0  ;;  %v190_v2 = vld [vmem:[#allocation2 + $0x28] sm:$0xff]  ;;  %v189_v3 = vld [vmem:[#allocation2 + $0x20] sm:$0xff]  ;;  %v188_v4 = vld [vmem:[#allocation2 + $0x18] sm:$0xff] }
   0x7   :  { %v187_v5 = vld [vmem:[#allocation2 + $0x10] sm:$0xff]  ;;  %v186_v6 = vld [vmem:[#allocation2 + $0x8] sm:$0xff]  ;;  %v185_v7 = vld [vmem:[#allocation2] sm:$0xff] }
   0x8   :  { %v184_v8 = vld [vmem:[%s262_s0] sm:$0xff] }
   0x9   :  { %v197_v9 = vld [vmem:[%s264_s2] ss:$0 sm:$0xff] }
   0xa   :  { %111 = vmatpush.bf16.msra.mxu0 %v191_v1 }
   0xe   :  { %112 = vmatpush.bf16.msra.mxu0 %v190_v2 }
  0x12   :  { %113 = vmatpush.bf16.msra.mxu0 %v189_v3 }
  0x16   :  { %114 = vmatpush.bf16.msra.mxu0 %v188_v4 }
  0x1a   :  { %115 = vmatpush.bf16.msra.mxu0 %v187_v5 }
  0x1e   :  { %116 = vmatpush.bf16.msra.mxu0 %v186_v6 }
  0x22   :  { %117 = vmatpush.bf16.msra.mxu0 %v185_v7 }
  0x25   :  { %118 = vmatmul.bf16.vlgmr.msra.gmra.mxu0 %v184_v8 }
  0xa2   :  { %v119_v10 = vpop.f32.mrf.mxu0 }
  0xa3   :  { %v137_v11 = vadd.f32 %v197_v9, %v119_v10 }
  0xa5   :  { %v139_v12 = vmax.f32 %v137_v11, 0.0 }
  0xa7   :  { %141 = vst [vmem:[%s265_s3] sm:$0xff] %v139_v12 }
  0xaa   :  { %v121_v13 = vpop.f32.mrf.mxu0 }
  0xab   :  { %v138_v14 = vadd.f32 %v197_v9, %v121_v13 }
  0xad   :  { %v140_v15 = vmax.f32 %v138_v14, 0.0 }
  0xaf   :  { %142 = vst [vmem:[%s265_s3 + $0x8] sm:$0xff] %v140_v15 }
  0xb0   :  { %147 = vsyncpa [#allocation3], 1 }

</bundles_post_ra>
